<compile_context>
chip_gen: v6e
topology: v6e:2x2x1
jax: 0.10.0
libtpu: 0.0.40
codegen_flags: <defaults>
</compile_context>

<pallas_src>
import functools

import jax
import jax.numpy as jnp
from jax.experimental import pallas as pl
from jax.experimental.pallas import tpu as pltpu


def _mlp_vpu_kernel(w1_ref, b1_ref, w2_ref, b2_ref, x_ref, o_ref):
    # w1_ref: (in_, hidden_)   SMEM scalars
    # b1_ref: (hidden_,)       SMEM
    # w2_ref: (hidden_, out_)  SMEM
    # b2_ref: (out_,)          SMEM
    # x_ref:  (in_, TB)        VMEM, TB multiple of 128 (lane-dense)
    # o_ref:  (out_, TB)       VMEM, lane-dense output store
    in_, tb = x_ref.shape
    hidden_ = b1_ref.shape[0]
    out_ = o_ref.shape[0]

    x = x_ref[...]  # (in_, TB) f32, held in vregs

    # Hidden layer: fully unrolled VPU broadcast-FMAs (no MXU for 2x3).
    hs = []
    for j in range(hidden_):
        h = jnp.full((1, tb), b1_ref[j], dtype=jnp.float32)
        for k in range(in_):
            h = h + w1_ref[k, j] * x[k : k + 1, :]
        hs.append(jnp.maximum(h, 0.0))  # F.relu

    # Output layer: one lane-dense store per output row.
    for o in range(out_):
        acc = jnp.full((1, tb), b2_ref[o], dtype=jnp.float32)
        for j in range(hidden_):
            acc = acc + w2_ref[j, o] * hs[j]
        o_ref[o : o + 1, :] = acc.astype(o_ref.dtype)


def _round_up(x, m):
    return ((x + m - 1) // m) * m


@functools.partial(jax.jit, static_argnames=("block_batch",))
def nnet_forward(x, w1, b1, w2, b2, *, block_batch=4096):
    """x: (N, in_) float32 -> (N, out_) float32 (PyTorch layout at boundary)."""
    n, in_ = x.shape
    hidden_ = w1.shape[1]
    out_ = w2.shape[1]

    # Lane-dense batch tile: multiple of 128, capped by block_batch.
    tb = max(128, (min(block_batch, _round_up(n, 128)) // 128) * 128)
    n_pad = _round_up(n, tb)

    xT = x.T  # (in_, n) — layout plumbing in the wrapper (XLA transpose)
    if n_pad != n:
        xT = jnp.pad(xT, ((0, 0), (0, n_pad - n)))

    grid = (n_pad // tb,)

    oT = pl.pallas_call(
        _mlp_vpu_kernel,
        out_shape=jax.ShapeDtypeStruct((out_, n_pad), jnp.float32),
        grid=grid,
        in_specs=[
            pl.BlockSpec(memory_space=pltpu.MemorySpace.SMEM),  # w1 (scalars)
            pl.BlockSpec(memory_space=pltpu.MemorySpace.SMEM),  # b1
            pl.BlockSpec(memory_space=pltpu.MemorySpace.SMEM),  # w2
            pl.BlockSpec(memory_space=pltpu.MemorySpace.SMEM),  # b2
            pl.BlockSpec((in_, tb), lambda i: (0, i)),           # xT tile
        ],
        out_specs=pl.BlockSpec((out_, tb), lambda i: (0, i)),
        compiler_params=pltpu.CompilerParams(
            dimension_semantics=("parallel",),  # shard grid across TCs (v7x)
        ),
    )(w1, b1, w2, b2, xT)

    return oT[:, :n].T  # back to (N, out_)


def init_params(key, in_=2, hidden_=3, out_=1):
    """PyTorch-style uniform init; weights pre-transposed to (fan_in, fan_out)."""
    k1, k2, k3, k4 = jax.random.split(key, 4)

    bound1 = 1.0 / jnp.sqrt(in_)
    w1 = jax.random.uniform(k1, (in_, hidden_), jnp.float32, -bound1, bound1)
    b1 = jax.random.uniform(k2, (hidden_,), jnp.float32, -bound1, bound1)

    bound2 = 1.0 / jnp.sqrt(hidden_)
    w2 = jax.random.uniform(k3, (hidden_, out_), jnp.float32, -bound2, bound2)
    b2 = jax.random.uniform(k4, (out_,), jnp.float32, -bound2, bound2)
    return w1, b1, w2, b2


def nnet_reference(x, w1, b1, w2, b2):
    """Pure-JAX reference (mirrors the PyTorch forward exactly)."""
    h = jnp.maximum(x @ w1 + b1, 0.0)
    return h @ w2 + b2


# TODO(synk): `Nnet.data_rearange` is a host-side CPU batching utility (random
# init + python loops over numpy tensors), not part of the forward pass; it has
# no Pallas equivalent and is intentionally not implemented as a kernel.


if __name__ == "__main__":
    key = jax.random.PRNGKey(0)
    kx, kp = jax.random.split(key)

    in_, hidden_, out_ = 2, 3, 1
    w1, b1, w2, b2 = init_params(kp, in_, hidden_, out_)

    # Small demo consistent with the module defaults (batch=8, in_=2).
    batch = 8
    x = jax.random.normal(kx, (batch, in_), dtype=jnp.float32)
    y = jax.block_until_ready(nnet_forward(x, w1, b1, w2, b2))
    y_ref = nnet_reference(x, w1, b1, w2, b2)
    assert y.shape == (batch, out_)
    assert jnp.allclose(y, y_ref, atol=1e-5, rtol=1e-5), "mismatch vs reference"

    # Multi-tile path (grid > 1) to exercise the pipelined lane-dense layout.
    batch2 = 512
    x2 = jax.random.normal(kx, (batch2, in_), dtype=jnp.float32)
    y2 = jax.block_until_ready(nnet_forward(x2, w1, b1, w2, b2, block_batch=128))
    y2_ref = nnet_reference(x2, w1, b1, w2, b2)
    assert y2.shape == (batch2, out_)
    assert jnp.allclose(y2, y2_ref, atol=1e-5, rtol=1e-5), "mismatch (tiled) vs reference"

    print("KERNEL_OK")
</pallas_src>

<mosaic_0001>
module attributes {stable_mosaic.version = 11 : i64} {
  func.func @_mlp_vpu_kernel(%arg0: i32, %arg1: memref<2x3xf32, #tpu.memory_space<smem>>, %arg2: memref<3xf32, #tpu.memory_space<smem>>, %arg3: memref<3x1xf32, #tpu.memory_space<smem>>, %arg4: memref<1xf32, #tpu.memory_space<smem>>, %arg5: memref<2x128xf32, #tpu.memory_space<vmem>>, %arg6: memref<1x128xf32, #tpu.memory_space<vmem>>) attributes {dimension_semantics = [#tpu.dimension_semantics<parallel>], iteration_bounds = array<i64: 1>, scalar_prefetch = 0 : i64, scratch_operands = 0 : i64, tpu.core_type = #tpu.core_type<tc>, window_params = [{transform_indices = @transform_0, window_bounds = array<i64: 2, 3>}, {transform_indices = @transform_1, window_bounds = array<i64: 3>}, {transform_indices = @transform_2, window_bounds = array<i64: 3, 1>}, {transform_indices = @transform_3, window_bounds = array<i64: 1>}, {transform_indices = @transform_4, window_bounds = array<i64: 2, 128>}, {transform_indices = @transform_5, window_bounds = array<i64: 1, 128>}]} {
    %c0 = arith.constant 0 : index
    %c0_0 = arith.constant 0 : index
    %0 = vector.load %arg5[%c0, %c0_0] : memref<2x128xf32, #tpu.memory_space<vmem>>, vector<2x128xf32>
    %c0_1 = arith.constant 0 : index
    %1 = memref.load %arg2[%c0_1] : memref<3xf32, #tpu.memory_space<smem>>
    %2 = vector.broadcast %1 : f32 to vector<1x128xf32>
    %c0_2 = arith.constant 0 : index
    %c0_3 = arith.constant 0 : index
    %3 = memref.load %arg1[%c0_2, %c0_3] : memref<2x3xf32, #tpu.memory_space<smem>>
    %4 = vector.extract_strided_slice %0 {offsets = [0, 0], sizes = [1, 128], strides = [1, 1]} : vector<2x128xf32> to vector<1x128xf32>
    %5 = vector.broadcast %3 : f32 to vector<1x128xf32>
    %6 = arith.mulf %5, %4 : vector<1x128xf32>
    %7 = arith.addf %2, %6 : vector<1x128xf32>
    %c1 = arith.constant 1 : index
    %c0_4 = arith.constant 0 : index
    %8 = memref.load %arg1[%c1, %c0_4] : memref<2x3xf32, #tpu.memory_space<smem>>
    %9 = vector.extract_strided_slice %0 {offsets = [1, 0], sizes = [1, 128], strides = [1, 1]} : vector<2x128xf32> to vector<1x128xf32>
    %10 = vector.broadcast %8 : f32 to vector<1x128xf32>
    %11 = arith.mulf %10, %9 : vector<1x128xf32>
    %12 = arith.addf %7, %11 : vector<1x128xf32>
    %cst = arith.constant 0.000000e+00 : f32
    %13 = vector.broadcast %cst : f32 to vector<1x128xf32>
    %14 = arith.maximumf %12, %13 : vector<1x128xf32>
    %c1_5 = arith.constant 1 : index
    %15 = memref.load %arg2[%c1_5] : memref<3xf32, #tpu.memory_space<smem>>
    %16 = vector.broadcast %15 : f32 to vector<1x128xf32>
    %c0_6 = arith.constant 0 : index
    %c1_7 = arith.constant 1 : index
    %17 = memref.load %arg1[%c0_6, %c1_7] : memref<2x3xf32, #tpu.memory_space<smem>>
    %18 = vector.extract_strided_slice %0 {offsets = [0, 0], sizes = [1, 128], strides = [1, 1]} : vector<2x128xf32> to vector<1x128xf32>
    %19 = vector.broadcast %17 : f32 to vector<1x128xf32>
    %20 = arith.mulf %19, %18 : vector<1x128xf32>
    %21 = arith.addf %16, %20 : vector<1x128xf32>
    %c1_8 = arith.constant 1 : index
    %c1_9 = arith.constant 1 : index
    %22 = memref.load %arg1[%c1_8, %c1_9] : memref<2x3xf32, #tpu.memory_space<smem>>
    %23 = vector.extract_strided_slice %0 {offsets = [1, 0], sizes = [1, 128], strides = [1, 1]} : vector<2x128xf32> to vector<1x128xf32>
    %24 = vector.broadcast %22 : f32 to vector<1x128xf32>
    %25 = arith.mulf %24, %23 : vector<1x128xf32>
    %26 = arith.addf %21, %25 : vector<1x128xf32>
    %cst_10 = arith.constant 0.000000e+00 : f32
    %27 = vector.broadcast %cst_10 : f32 to vector<1x128xf32>
    %28 = arith.maximumf %26, %27 : vector<1x128xf32>
    %c2 = arith.constant 2 : index
    %29 = memref.load %arg2[%c2] : memref<3xf32, #tpu.memory_space<smem>>
    %30 = vector.broadcast %29 : f32 to vector<1x128xf32>
    %c0_11 = arith.constant 0 : index
    %c2_12 = arith.constant 2 : index
    %31 = memref.load %arg1[%c0_11, %c2_12] : memref<2x3xf32, #tpu.memory_space<smem>>
    %32 = vector.extract_strided_slice %0 {offsets = [0, 0], sizes = [1, 128], strides = [1, 1]} : vector<2x128xf32> to vector<1x128xf32>
    %33 = vector.broadcast %31 : f32 to vector<1x128xf32>
    %34 = arith.mulf %33, %32 : vector<1x128xf32>
    %35 = arith.addf %30, %34 : vector<1x128xf32>
    %c1_13 = arith.constant 1 : index
    %c2_14 = arith.constant 2 : index
    %36 = memref.load %arg1[%c1_13, %c2_14] : memref<2x3xf32, #tpu.memory_space<smem>>
    %37 = vector.extract_strided_slice %0 {offsets = [1, 0], sizes = [1, 128], strides = [1, 1]} : vector<2x128xf32> to vector<1x128xf32>
    %38 = vector.broadcast %36 : f32 to vector<1x128xf32>
    %39 = arith.mulf %38, %37 : vector<1x128xf32>
    %40 = arith.addf %35, %39 : vector<1x128xf32>
    %cst_15 = arith.constant 0.000000e+00 : f32
    %41 = vector.broadcast %cst_15 : f32 to vector<1x128xf32>
    %42 = arith.maximumf %40, %41 : vector<1x128xf32>
    %c0_16 = arith.constant 0 : index
    %43 = memref.load %arg4[%c0_16] : memref<1xf32, #tpu.memory_space<smem>>
    %44 = vector.broadcast %43 : f32 to vector<1x128xf32>
    %c0_17 = arith.constant 0 : index
    %c0_18 = arith.constant 0 : index
    %45 = memref.load %arg3[%c0_17, %c0_18] : memref<3x1xf32, #tpu.memory_space<smem>>
    %46 = vector.broadcast %45 : f32 to vector<1x128xf32>
    %47 = arith.mulf %46, %14 : vector<1x128xf32>
    %48 = arith.addf %44, %47 : vector<1x128xf32>
    %c1_19 = arith.constant 1 : index
    %c0_20 = arith.constant 0 : index
    %49 = memref.load %arg3[%c1_19, %c0_20] : memref<3x1xf32, #tpu.memory_space<smem>>
    %50 = vector.broadcast %49 : f32 to vector<1x128xf32>
    %51 = arith.mulf %50, %28 : vector<1x128xf32>
    %52 = arith.addf %48, %51 : vector<1x128xf32>
    %c2_21 = arith.constant 2 : index
    %c0_22 = arith.constant 0 : index
    %53 = memref.load %arg3[%c2_21, %c0_22] : memref<3x1xf32, #tpu.memory_space<smem>>
    %54 = vector.broadcast %53 : f32 to vector<1x128xf32>
    %55 = arith.mulf %54, %42 : vector<1x128xf32>
    %56 = arith.addf %52, %55 : vector<1x128xf32>
    %c0_23 = arith.constant 0 : index
    %c0_24 = arith.constant 0 : index
    %57 = vector.load %arg6[%c0_23, %c0_24] : memref<1x128xf32, #tpu.memory_space<vmem>>, vector<1x128xf32>
    tpu.vector_store %arg6[%c0_23, %c0_24], %56 {strides = array<i32>} : memref<1x128xf32, #tpu.memory_space<vmem>>, vector<1x128xf32>,
    return
  }
  func.func @transform_0(%arg0: i32) -> (i32, i32) {
    %c0_i32 = arith.constant 0 : i32
    %c0_i32_0 = arith.constant 0 : i32
    %c0_i32_1 = arith.constant 0 : i32
    return %c0_i32, %c0_i32_0 : i32, i32
  }
  func.func @transform_1(%arg0: i32) -> i32 {
    %c0_i32 = arith.constant 0 : i32
    %c0_i32_0 = arith.constant 0 : i32
    return %c0_i32 : i32
  }
  func.func @transform_2(%arg0: i32) -> (i32, i32) {
    %c0_i32 = arith.constant 0 : i32
    %c0_i32_0 = arith.constant 0 : i32
    %c0_i32_1 = arith.constant 0 : i32
    return %c0_i32, %c0_i32_0 : i32, i32
  }
  func.func @transform_3(%arg0: i32) -> i32 {
    %c0_i32 = arith.constant 0 : i32
    %c0_i32_0 = arith.constant 0 : i32
    return %c0_i32 : i32
  }
  func.func @transform_4(%arg0: i32) -> (i32, i32) {
    %c0_i32 = arith.constant 0 : i32
    %c0_i32_0 = arith.constant 0 : i32
    return %c0_i32, %arg0 : i32, i32
  }
  func.func @transform_5(%arg0: i32) -> (i32, i32) {
    %c0_i32 = arith.constant 0 : i32
    %c0_i32_0 = arith.constant 0 : i32
    return %c0_i32, %arg0 : i32, i32
  }
}

</mosaic_0001>

<bundles_post_ra>
// kernel: nnet_forward.1
= control target key start
LH: loop header
LB: loop body
LE: loop exit
PB: predicated region body
PF: predicated region fallthrough
CT: control target
= control target key end

     0   :  { %11 = vsyncpa [#allocation4], 0  ;;  %s224_s0 = inlined_call_operand.vmem [shape: f32[2,3], index: 0, kind: input, shape index: {}]   ;;  %s225_s1 = inlined_call_operand.vmem [shape: f32[3], index: 1, kind: input, shape index: {}]   ;;  %s226_s2 = inlined_call_operand.vmem [shape: f32[3,1], index: 2, kind: input, shape index: {}]   ;;  %s227_s3 = inlined_call_operand.<no memory space> [shape: f32[1], index: 3, kind: input, shape index: {}]   ;;  %s228_s4 = inlined_call_operand.vmem [shape: f32[2,128], index: 4, kind: input, shape index: {}]   ;;  %s229_s5 = inlined_call_operand.vmem [shape: f32[1,128], index: 5, kind: output, shape index: {}]  }
   0x1   :  { %12 = vsyncpa [#allocation6], 0  ;;  %s29_s20 = sshll.u32 %s225_s1, 4  ;;  %s19_s23 = sshll.u32 %s224_s0, 4  ;;  %s30_s20 = int_to_ptr.vmem [resolvable:$true] %s29_s20  ;;  %s20_s23 = int_to_ptr.vmem [resolvable:$true] %s19_s23 }
   0x2   :  { %s133_s24 = scalar_lea.vmem %s30_s20, 16  ;;  %p138_p1 = scmp.lt.s32.totalorder %s30_s20, %s30_s20 }
   0x3   :  { %p134_p0 = scmp.ne.s32.totalorder %s30_s20, %s133_s24  ;;  %p139_p2 = scmp.lt.s32.totalorder %s133_s24, %s133_s24 }
   0x5   :  { %p140_p3 = por %p139_p2, %p138_p1 }
   0x7   :  { %p141_p4 = pnand %p140_p3, %p134_p0 }
   0x9   :  { %144 = shalt.err (!%p141_p4)
}
   0xa   :  { %s173_s25 = smov [#allocation5]   ;;  %s145_s26 = scalar_lea.vmem %s20_s23, 32 }
   0xb   :  { %32 = dma.vmem_to_smem %s30_s20, 16, %s173_s25, [#allocation6]  }
   0xc   :  { %p146_p5 = scmp.ne.s32.totalorder %s20_s23, %s145_s26  ;;  %p150_p6 = scmp.lt.s32.totalorder %s20_s23, %s20_s23 }
   0xd   :  { %p151_p7 = scmp.lt.s32.totalorder %s145_s26, %s145_s26 }
   0xf   :  { %p152_p8 = por %p151_p7, %p150_p6 }
  0x11   :  { %p153_p9 = pnand %p152_p8, %p146_p5 }
  0x13   :  { %156 = shalt.err (!%p153_p9)
}
  0x14   :  { %s174_s1 = smov [#allocation3]   ;;  %s39_s28 = sshll.u32 %s226_s2, 4  ;;  %s40_s28 = int_to_ptr.vmem [resolvable:$true] %s39_s28 }
  0x15   :  { %22 = dma.vmem_to_smem %s20_s23, 32, %s174_s1, [#allocation4]  }
  0x16   :  { %s157_s29 = scalar_lea.vmem %s40_s28, 64  ;;  %p162_p11 = scmp.lt.s32.totalorder %s40_s28, %s40_s28 }
  0x17   :  { %p158_p10 = scmp.ne.s32.totalorder %s40_s28, %s157_s29  ;;  %p163_p12 = scmp.lt.s32.totalorder %s157_s29, %s157_s29 }
  0x19   :  { %p164_p13 = por %p163_p12, %p162_p11 }
  0x1b   :  { %p165_p0 = pnand %p164_p13, %p158_p10 }
  0x1d   :  { %168 = shalt.err (!%p165_p0)
}
  0x1e   :  { %s175_s30 = smov [#allocation7]  }
  0x1f   :  { %42 = dma.vmem_to_smem %s40_s28, 64, %s175_s30, [#allocation6]  }
  0x20   :  { %169 = dma.done.wait [#allocation4], 32  }
  0x21   :  { %170 = vsyncadd [#allocation4], 4294967264 }
  0x22   :  { %171 = dma.done.wait [#allocation6], 80  }
  0x23   :  { %172 = vsyncadd [#allocation6], 4294967216 }
  0x24   :  { %56 = sfence }
  0x25   :  { %s58_s6 = sld [smem:[#allocation5]]  ;;  %v57_v0 = vld [vmem:[%s228_s4] sm:$0x3]  ;;  %v101_v25 = vstv %s227_s3 }
  0x26   :  { %s60_s7 = sld [smem:[#allocation3]] }
  0x27   :  { %s121_s8 = sld [smem:[#allocation3 + $0x80]] }
  0x28   :  { %s122_s9 = sld [smem:[#allocation5 + $0x1]] }
  0x29   :  { %s123_s2 = sld [smem:[#allocation3 + $0x1]] }
  0x2a   :  { %s124_s12 = sld [smem:[#allocation3 + $0x81]] }
  0x2b   :  { %s125_s13 = sld [smem:[#allocation5 + $0x2]]  ;;  %v59_v1 = vstv %s58_s6 }
  0x2c   :  { %v61_v2 = vstv %s60_s7  ;;  %s126_s14 = sld [smem:[#allocation3 + $0x2]] }
  0x2d   :  { %v62_v3 = vmul.f32 %v61_v2, %v57_v0  ;;  %v65_v4 = vstv %s121_s8  ;;  %s127_s15 = sld [smem:[#allocation3 + $0x82]] }
  0x2e   :  { %v66_v5 = vmul.f32 %v65_v4, %v57_v0  ;;  %s102_s16 = sld [smem:[#allocation7]]  ;;  %v73_v7 = vstv %s122_s9 }
  0x2f   :  { %v63_v6 = vadd.f32 %v62_v3, %v59_v1  ;;  %v75_v8 = vstv %s123_s2  ;;  %s128_s17 = sld [smem:[#allocation7 + $0x80]] }
  0x30   :  { %v68_v9 = vrot.slane %v66_v5, 1  ;;  %v76_v10 = vmul.f32 %v75_v8, %v57_v0  ;;  %v79_v11 = vstv %s124_s12  ;;  %s129_s18 = sld [smem:[#allocation7 + $0x100]] }
  0x31   :  { %v80_v12 = vmul.f32 %v79_v11, %v57_v0  ;;  %v87_v15 = vstv %s125_s13 }
  0x32   :  { %v70_v13 = vadd.f32 %v68_v9, %v63_v6  ;;  %v77_v14 = vadd.f32 %v76_v10, %v73_v7  ;;  %v89_v16 = vstv %s126_s14 }
  0x33   :  { %v82_v17 = vrot.slane %v80_v12, 1  ;;  %v90_v18 = vmul.f32 %v89_v16, %v57_v0  ;;  %v93_v19 = vstv %s127_s15 }
  0x34   :  { %v71_v20 = vmax.f32 %v70_v13, 0.0  ;;  %v94_v21 = vmul.f32 %v93_v19, %v57_v0  ;;  %v103_v22 = vstv %s102_s16 }
  0x35   :  { %v84_v23 = vadd.f32 %v82_v17, %v77_v14  ;;  %v91_v24 = vadd.f32 %v90_v18, %v87_v15  ;;  %v107_v28 = vstv %s128_s17 }
  0x36   :  { %v96_v26 = vrot.slane %v94_v21, 1  ;;  %v104_v27 = vmul.f32 %v103_v22, %v71_v20  ;;  %v111_v33 = vstv %s129_s18 }
  0x37   :  { %v85_v29 = vmax.f32 %v84_v23, 0.0 }
  0x38   :  { %v98_v30 = vadd.f32 %v96_v26, %v91_v24  ;;  %v105_v31 = vadd.f32 %v104_v27, %v101_v25 }
  0x39   :  { %v108_v32 = vmul.f32 %v107_v28, %v85_v29 }
  0x3a   :  { %v99_v34 = vmax.f32 %v98_v30, 0.0 }
  0x3b   :  { %v109_v35 = vadd.f32 %v108_v32, %v105_v31 }
  0x3c   :  { %v112_v36 = vmul.f32 %v111_v33, %v99_v34 }
  0x3e   :  { %v113_v37 = vadd.f32 %v112_v36, %v109_v35 }
  0x40   :  { %114 = vst [vmem:[%s229_s5] sm:$0x1] %v113_v37 }
  0x41   :  { %119 = vsyncpa [#allocation4], 1 }
  0x42   :  { %120 = vsyncpa [#allocation6], 1 }

</bundles_post_ra>
